<compile_context>
chip_gen: v7x
topology: tpu7x:2x2x1
jax: 0.10.0
libtpu: 0.0.40
codegen_flags: <defaults>
</compile_context>

<pallas_src>
import jax
import jax.numpy as jnp
from jax import lax
from jax.experimental import pallas as pl
from jax.experimental.pallas import tpu as pltpu


def _frozen_bn_kernel(scale_ref, shift_ref, x_ref, o_ref):
    # x tile: (rb, cb); scale/shift tiles: (rb, 1) -> broadcast over lanes.
    x = x_ref[...].astype(jnp.float32)
    o_ref[...] = (x * scale_ref[...] + shift_ref[...]).astype(o_ref.dtype)


def _choose_block(total_rows, row_len, itemsize, target_bytes=2 << 20):
    """Pick (row_block, col_block) so a tile is ~target_bytes and layout-legal."""
    # Column (lane) block: full row unless a single row already exceeds the
    # target AND it can be split into 128-multiples.
    if row_len * itemsize <= target_bytes or row_len % 128 != 0:
        cb = row_len  # full extent is always a legal block size
    else:
        cb = max(128, min(row_len, (target_bytes // itemsize) // 128 * 128))

    # Row (sublane) block: multiple of the sublane packing for this dtype
    # (8 for f32, 16 for bf16), or the full row extent.
    sub = 8 * max(1, 4 // itemsize)
    rows_per_block = max(1, target_bytes // (cb * itemsize))
    if rows_per_block >= total_rows:
        rb = total_rows
    else:
        rb = min(max(sub, (rows_per_block // sub) * sub), total_rows)
    return rb, cb


def frozen_batchnorm2d(x, weight, bias, running_mean, running_var, eps=1e-5):
    """x: (N, C, H, W). Per-channel params: (C,)."""
    N, C, H, W = x.shape
    total, L = N * C, H * W
    itemsize = jnp.dtype(x.dtype).itemsize

    # Frozen affine folded into a single scale/shift per channel (f32 math).
    scale = (weight.astype(jnp.float32)
             * lax.rsqrt(running_var.astype(jnp.float32) + jnp.float32(eps)))
    shift = bias.astype(jnp.float32) - running_mean.astype(jnp.float32) * scale

    # Contiguous, free reshape for NCHW: one row per (n, c) plane.
    x2 = x.reshape(total, L)
    scale_rows = jnp.tile(scale, N).reshape(total, 1)
    shift_rows = jnp.tile(shift, N).reshape(total, 1)

    rb, cb = _choose_block(total, L, itemsize)
    grid = (pl.cdiv(total, rb), pl.cdiv(L, cb))

    cost = pl.CostEstimate(
        flops=2 * N * C * H * W,
        transcendentals=0,  # rsqrt is folded into the wrapper
        bytes_accessed=2 * x.size * itemsize + 2 * total * 4,
    )

    out2 = pl.pallas_call(
        _frozen_bn_kernel,
        out_shape=jax.ShapeDtypeStruct((total, L), x.dtype),
        grid=grid,
        in_specs=[
            pl.BlockSpec((rb, 1), lambda i, j: (i, 0)),   # scale  (N*C, 1)
            pl.BlockSpec((rb, 1), lambda i, j: (i, 0)),   # shift  (N*C, 1)
            pl.BlockSpec((rb, cb), lambda i, j: (i, j)),  # x      (N*C, H*W)
        ],
        out_specs=pl.BlockSpec((rb, cb), lambda i, j: (i, j)),
        compiler_params=pltpu.CompilerParams(
            dimension_semantics=("parallel", "parallel")
        ),
        cost_estimate=cost,
    )(scale_rows, shift_rows, x2)

    return out2.reshape(N, C, H, W)


def frozen_batchnorm2d_ref(x, weight, bias, running_mean, running_var, eps=1e-5):
    w = weight.reshape(1, -1, 1, 1)
    b = bias.reshape(1, -1, 1, 1)
    rv = running_var.reshape(1, -1, 1, 1)
    rm = running_mean.reshape(1, -1, 1, 1)
    scale = w * lax.rsqrt(rv + eps)
    shift = b - rm * scale
    return x * scale + shift


if __name__ == "__main__":
    key = jax.random.PRNGKey(0)
    kx, kw, kb, km, kv, kx2 = jax.random.split(key, 6)

    # Primary small test (module-consistent shapes).
    N, C, H, W = 2, 4, 16, 16
    x = jax.random.normal(kx, (N, C, H, W), dtype=jnp.float32)

    weight = 1.0 + 0.1 * jax.random.normal(kw, (C,), dtype=jnp.float32)
    bias = 0.1 * jax.random.normal(kb, (C,), dtype=jnp.float32)
    running_mean = 0.2 * jax.random.normal(km, (C,), dtype=jnp.float32)
    running_var = jax.random.uniform(
        kv, (C,), dtype=jnp.float32, minval=0.5, maxval=1.5
    )

    out = frozen_batchnorm2d(x, weight, bias, running_mean, running_var, eps=1e-5)
    out = jax.block_until_ready(out)
    ref = frozen_batchnorm2d_ref(x, weight, bias, running_mean, running_var, eps=1e-5)
    assert out.shape == ref.shape and out.dtype == ref.dtype
    assert jnp.allclose(out, ref, atol=1e-5, rtol=1e-5)

    # Secondary test: non-128-multiple spatial size (falls back to full-row block).
    x2 = jax.random.normal(kx2, (N, C, 7, 9), dtype=jnp.float32)
    out2 = jax.block_until_ready(
        frozen_batchnorm2d(x2, weight, bias, running_mean, running_var, eps=1e-5)
    )
    ref2 = frozen_batchnorm2d_ref(x2, weight, bias, running_mean, running_var, eps=1e-5)
    assert jnp.allclose(out2, ref2, atol=1e-5, rtol=1e-5)

    print("KERNEL_OK")
</pallas_src>

<mosaic_0001>
module attributes {stable_mosaic.version = 11 : i64} {
  func.func @_frozen_bn_kernel(%arg0: i32, %arg1: i32, %arg2: memref<8x1xf32, #tpu.memory_space<vmem>>, %arg3: memref<8x1xf32, #tpu.memory_space<vmem>>, %arg4: memref<8x256xf32, #tpu.memory_space<vmem>>, %arg5: memref<8x256xf32, #tpu.memory_space<vmem>>) attributes {dimension_semantics = [#tpu.dimension_semantics<parallel>, #tpu.dimension_semantics<parallel>], iteration_bounds = array<i64: 1, 1>, scalar_prefetch = 0 : i64, scratch_operands = 0 : i64, tpu.core_type = #tpu.core_type<tc>, window_params = [{transform_indices = @transform_0, window_bounds = array<i64: 8, 1>}, {transform_indices = @transform_1, window_bounds = array<i64: 8, 1>}, {transform_indices = @transform_2, window_bounds = array<i64: 8, 256>}, {transform_indices = @transform_3, window_bounds = array<i64: 8, 256>}]} {
    %c0 = arith.constant 0 : index
    %c0_0 = arith.constant 0 : index
    %0 = vector.load %arg4[%c0, %c0_0] : memref<8x256xf32, #tpu.memory_space<vmem>>, vector<8x256xf32>
    %c0_1 = arith.constant 0 : index
    %c0_2 = arith.constant 0 : index
    %1 = vector.load %arg2[%c0_1, %c0_2] : memref<8x1xf32, #tpu.memory_space<vmem>>, vector<8x1xf32>
    %2 = vector.broadcast %1 : vector<8x1xf32> to vector<8x256xf32>
    %3 = arith.mulf %0, %2 : vector<8x256xf32>
    %c0_3 = arith.constant 0 : index
    %c0_4 = arith.constant 0 : index
    %4 = vector.load %arg3[%c0_3, %c0_4] : memref<8x1xf32, #tpu.memory_space<vmem>>, vector<8x1xf32>
    %5 = vector.broadcast %4 : vector<8x1xf32> to vector<8x256xf32>
    %6 = arith.addf %3, %5 : vector<8x256xf32>
    %c0_5 = arith.constant 0 : index
    %c0_6 = arith.constant 0 : index
    %7 = vector.load %arg5[%c0_5, %c0_6] : memref<8x256xf32, #tpu.memory_space<vmem>>, vector<8x256xf32>
    tpu.vector_store %arg5[%c0_5, %c0_6], %6 {strides = array<i32>} : memref<8x256xf32, #tpu.memory_space<vmem>>, vector<8x256xf32>,
    return
  }
  func.func @transform_0(%arg0: i32, %arg1: i32) -> (i32, i32) {
    %c0_i32 = arith.constant 0 : i32
    %c0_i32_0 = arith.constant 0 : i32
    return %arg0, %c0_i32 : i32, i32
  }
  func.func @transform_1(%arg0: i32, %arg1: i32) -> (i32, i32) {
    %c0_i32 = arith.constant 0 : i32
    %c0_i32_0 = arith.constant 0 : i32
    return %arg0, %c0_i32 : i32, i32
  }
  func.func @transform_2(%arg0: i32, %arg1: i32) -> (i32, i32) {
    %c0_i32 = arith.constant 0 : i32
    return %arg0, %arg1 : i32, i32
  }
  func.func @transform_3(%arg0: i32, %arg1: i32) -> (i32, i32) {
    %c0_i32 = arith.constant 0 : i32
    return %arg0, %arg1 : i32, i32
  }
}

</mosaic_0001>

<bundles_post_ra>
// kernel: tpu_custom_call.1
= control target key start
LH: loop header
LB: loop body
LE: loop exit
PB: predicated region body
PF: predicated region fallthrough
CT: control target
= control target key end

     0   :  { %s122_s0 = inlined_call_operand.vmem [shape: f32[8,1], index: 0, kind: input, shape index: {}]   ;;  %s123_s1 = inlined_call_operand.vmem [shape: f32[8,1], index: 1, kind: input, shape index: {}]   ;;  %s124_s2 = inlined_call_operand.vmem [shape: f32[8,256], index: 2, kind: input, shape index: {}]   ;;  %s125_s3 = inlined_call_operand.hbm [shape: f32[8,256], index: 3, kind: output, shape index: {}]  }
   0x1   :  { %v17_v0 = vld [vmem:[%s122_s0] sm:$0xff] }
   0x2   :  { %8 = vsyncpa [#allocation3], 0  ;;  %v76_v1 = vmov 0   ;;  %v25_v2 = vld [vmem:[%s123_s1] sm:$0xff]  ;;  %v16_v5 = vld [vmem:[%s124_s2 + $0x8] sm:$0xff]  ;;  %s77_s20 = smov [#allocation2]  }
   0x3   :  { %51 = vset.pattern.permute.xlu0 %v76_v1  ;;  %v15_v4 = vld [vmem:[%s124_s2] sm:$0xff]  ;;  %s41_s0 = sshll.u32 %s77_s20, 4  ;;  %s42_s0 = int_to_ptr.vmem [resolvable:$true] %s41_s0 }
   0x4   :  { %20 = vperm.xlu0 %51, %v17_v0   ;;  %s52_s1 = scalar_lea.vmem %s42_s0, 256  ;;  %p57_p1 = scmp.lt.s32.totalorder %s42_s0, %s42_s0 }
   0x5   :  { %p53_p0 = scmp.ne.s32.totalorder %s42_s0, %s52_s1  ;;  %p58_p2 = scmp.lt.s32.totalorder %s52_s1, %s52_s1 }
   0x7   :  { %p59_p3 = por %p58_p2, %p57_p1 }
   0x8   :  { %28 = vperm.xlu0 %51, %v25_v2  }
   0x9   :  { %p60_p4 = pnand %p59_p3, %p53_p0 }
  0x83   :  { %v21_v3 = vpop.permute.xlu0 %20 }
  0x84   :  { %v23_v6 = vmul.f32 %v21_v3, %v15_v4  ;;  %v24_v7 = vmul.f32 %v21_v3, %v16_v5 }
  0x87   :  { %v29_v8 = vpop.permute.xlu0 %28 }
  0x88   :  { %v31_v9 = vadd.f32 %v29_v8, %v23_v6  ;;  %v32_v10 = vadd.f32 %v29_v8, %v24_v7 }
  0x8a   :  { %33 = vst [vmem:[#allocation2] sm:$0xff] %v31_v9  ;;  %34 = vst [vmem:[#allocation2 + $0x8] sm:$0xff] %v32_v10 }
  0x8b   :  { %63 = shalt.err (!%p60_p4)
}
  0x8c   :  { %s64_s2 = scalar_lea.hbm %s125_s3, 256 }
  0x8d   :  { %p65_p5 = scmp.ne.s32.totalorder %s125_s3, %s64_s2  ;;  %p68_p6 = scmp.lt.u32.totalorder %s64_s2, %s125_s3 }
  0x8f   :  { %p70_p7 = pnand %p68_p6, %p65_p5 }
  0x91   :  { %73 = shalt.err (!%p70_p7)
}
  0x92   :  { %44 = dma.vmem_to_hbm [thread:$0]  %s42_s0, 256, %s125_s3, [#allocation3]  }
  0x93   :  { %74 = dma.done.wait [#allocation3], 256  }
  0x94   :  { %75 = vsyncadd [#allocation3], 4294967040 }
  0x95   :  { %48 = vsyncpa [#allocation3], 1 }

</bundles_post_ra>
